<compile_context>
chip_gen: v7x
topology: tpu7x:2x2x1
jax: 0.10.0
libtpu: 0.0.40
codegen_flags: <defaults>
</compile_context>

<pallas_src>
from functools import partial

import numpy as np
import jax
import jax.numpy as jnp
from jax.experimental import pallas as pl
from jax.experimental.pallas import tpu as pltpu


def _roi_align_group_kernel(gb_ref, wy_ref, wxb_ref, feat_ref, out_ref, *, G, ch_pad):
    """One grid step = one group of G ROIs that share a batch id.

    gb_ref:   (NG,) int32 SMEM  scalar-prefetched group->batch map (used only by index_map)
    wy_ref:   (G*ch_pad, H)     stacked per-ROI y-interp weights (zero rows for padding)
    wxb_ref:  (G, W*C, cwC_pad) per-ROI block-diagonal x-interp weights (zero-padded cols)
    feat_ref: (H, W*C)          lane-dense feature slab of this group's batch
    out_ref:  (G*ch_pad, cwC_pad)
    """
    del gb_ref
    f32 = jnp.float32
    cdtype = wxb_ref.dtype

    # y-interp for the whole group in one MXU matmul (M = G*ch_pad, not 7).
    t = jnp.dot(wy_ref[...], feat_ref[...], preferred_element_type=f32)     # (G*ch_pad, W*C)
    t = t.astype(cdtype)                                                     # bf16 fast path if input bf16

    # x-interp per ROI: small static unroll of 2-D matmuls; all slices/stores 8/128-aligned.
    for g in range(G):
        tg = t[g * ch_pad:(g + 1) * ch_pad, :]                               # (ch_pad, W*C)
        og = jnp.dot(tg, wxb_ref[g], preferred_element_type=f32)             # (ch_pad, cwC_pad)
        out_ref[g * ch_pad:(g + 1) * ch_pad, :] = og.astype(out_ref.dtype)


def roi_align(features, rois, crop_height, crop_width, spatial_scale, *, group_size=8):
    """features: (B, C, H, W) NCHW; rois: (R, 5) = (batch_id, x0, y0, x1, y1).

    Returns (R, C, crop_height, crop_width), matching the PyTorch module."""
    B, C, H, W = features.shape
    R = rois.shape[0]
    ch, cw = int(crop_height), int(crop_width)
    G = int(group_size)
    i32, f32 = jnp.int32, jnp.float32
    cdtype = features.dtype                       # never upcast: bf16 features -> bf16 MXU

    # ---- static layout sizes -----------------------------------------------------------
    ch_pad = -(-ch // 8) * 8                      # sublane-aligned crop rows per ROI
    cwC = cw * C
    cwC_pad = -(-cwC // 128) * 128                # lane-dense (unmasked-store) output width
    NG = R // G + B                               # static upper bound on #batch-aligned groups
    S = NG * G                                    # total ROI slots

    # ---- box preprocessing (matches the PyTorch forward, plus documented guards) --------
    ids = jnp.clip(rois[:, 0].astype(i32), 0, B - 1)
    scale = f32(spatial_scale)
    dw = float(max(W - 1, 1))
    dh = float(max(H - 1, 1))
    x0 = rois[:, 1].astype(f32) * scale / dw
    y0 = rois[:, 2].astype(f32) * scale / dh
    x1 = rois[:, 3].astype(f32) * scale / dw
    y1 = rois[:, 4].astype(f32) * scale / dh

    # ---- per-ROI interpolation weights (hoisted out of the kernel) ----------------------
    EPS = 1e-4  # border-validity slack (f32 rounding vs the f64 reference), in pixels

    def interp_weights(lo, hi, n_out, n_in):
        # lo/hi: (R,) normalized box edges.  Returns (R, n_out, n_in) f32 weights with
        # bilinear lerp + out-of-image zeroing folded in.
        if n_out > 1:
            step = (hi - lo) * (n_in - 1) / (n_out - 1)
            pos = lo[:, None] * (n_in - 1) + jnp.arange(n_out, dtype=f32)[None, :] * step[:, None]
        else:
            pos = jnp.broadcast_to(0.5 * (lo + hi)[:, None] * (n_in - 1), (R, 1))
        valid = (pos >= -EPS) & (pos <= (n_in - 1) + EPS)
        pos_c = jnp.clip(pos, 0.0, float(n_in - 1))
        lo_i = jnp.floor(pos_c).astype(i32)
        hi_i = jnp.ceil(pos_c).astype(i32)
        frac = pos_c - jnp.floor(pos_c)
        grid = jnp.arange(n_in, dtype=i32)
        w = ((1.0 - frac)[..., None] * (lo_i[..., None] == grid).astype(f32)
             + frac[..., None] * (hi_i[..., None] == grid).astype(f32))
        return w * valid[..., None].astype(f32)

    wy = interp_weights(y0, y1, ch, H)                                        # (R, ch, H)
    wx = interp_weights(x0, x1, cw, W)                                        # (R, cw, W)

    # Block-diagonal expansion on the flattened W*C lane axis:
    #   Wxb[r, w*C + c, j*C + d] = wx[r, j, w] * (c == d)
    wxb = jnp.einsum("rjw,cd->rwcjd", wx, jnp.eye(C, dtype=f32)).reshape(R, W * C, cwC)

    # ---- batch-aligned grouping: scatter ROIs into NG groups x G slots -------------------
    order = jnp.argsort(ids)
    inv_order = jnp.argsort(order)
    ids_s = ids[order]
    counts = jnp.bincount(ids_s, length=B).astype(i32)                       # ROIs per batch
    groups_per_batch = (counts + G - 1) // G
    group_start = jnp.concatenate([jnp.zeros((1,), i32),
                                   jnp.cumsum(groups_per_batch)[:-1].astype(i32)])
    batch_start = jnp.concatenate([jnp.zeros((1,), i32),
                                   jnp.cumsum(counts)[:-1].astype(i32)])
    rank = jnp.arange(R, dtype=i32) - batch_start[ids_s]
    roi_slot_sorted = (group_start[ids_s] + rank // G) * G + rank % G
    slot = roi_slot_sorted[inv_order]                                        # slot per original ROI

    wy_slots = jnp.zeros((S, ch_pad, H), cdtype).at[slot, :ch, :].set(wy.astype(cdtype))
    wxb_slots = jnp.zeros((S, W * C, cwC_pad), cdtype).at[slot, :, :cwC].set(wxb.astype(cdtype))
    # Unused trailing groups default to the largest batch id so they reuse the resident slab.
    group_batch = jnp.full((NG,), jnp.max(ids), dtype=i32).at[slot // G].set(ids)

    wy_in = wy_slots.reshape(NG, G * ch_pad, H)
    wxb_in = wxb_slots.reshape(NG, G, W * C, cwC_pad)

    # NCHW -> lane-dense (B, H, W*C) slab (small-C path; boundary transposes only keep the
    # module's NCHW-in / NCHW-out contract).
    feats = jnp.transpose(features, (0, 2, 3, 1)).reshape(B, H, W * C)

    # ---- pallas call ---------------------------------------------------------------------
    grid_spec = pltpu.PrefetchScalarGridSpec(
        num_scalar_prefetch=1,                                               # group_batch -> SMEM
        grid=(NG,),
        in_specs=[
            pl.BlockSpec((None, G * ch_pad, H), lambda g, gb: (g, 0, 0)),          # Wy block
            pl.BlockSpec((None, G, W * C, cwC_pad), lambda g, gb: (g, 0, 0, 0)),   # Wxb block
            pl.BlockSpec((None, H, W * C), lambda g, gb: (gb[g], 0, 0)),           # feature slab
        ],
        out_specs=pl.BlockSpec((None, G * ch_pad, cwC_pad), lambda g, gb: (g, 0, 0)),
    )

    itemsize = jnp.dtype(cdtype).itemsize
    block_bytes = itemsize * (G * ch_pad * H + G * W * C * cwC_pad + H * W * C
                              + G * ch_pad * cwC_pad)
    vmem_est = 2 * block_bytes + (2 << 20)
    params = {"dimension_semantics": ("parallel",)}
    if vmem_est > (16 << 20):
        # Mid-size feature maps: raise the scoped-VMEM limit (with headroom, capped).
        # TODO(synk): production-size maps need row-band / gather staging (v7x: 64 MiB VMEM).
        params["vmem_limit_bytes"] = int(min(vmem_est * 5 // 4, 100 << 20))

    out_groups = pl.pallas_call(
        partial(_roi_align_group_kernel, G=G, ch_pad=ch_pad),
        out_shape=jax.ShapeDtypeStruct((NG, G * ch_pad, cwC_pad), cdtype),
        grid_spec=grid_spec,
        compiler_params=pltpu.CompilerParams(**params),
    )(group_batch, wy_in, wxb_in, feats)

    # ---- un-pad / un-group / return NCHW crops (R, C, crop_h, crop_w) --------------------
    out_slots = out_groups.reshape(S, ch_pad, cwC_pad)
    out = out_slots[slot][:, :ch, :cwC].reshape(R, ch, cw, C)
    return jnp.transpose(out, (0, 3, 1, 2))


def _reference(features, rois, crop_height, crop_width, spatial_scale):
    """Pure NumPy TF crop_and_resize reference (bilinear, extrapolation_value=0)."""
    feats = np.asarray(features, np.float64)
    rois = np.asarray(rois, np.float64)
    B, C, H, W = feats.shape
    R = rois.shape[0]
    out = np.zeros((R, C, crop_height, crop_width), np.float64)
    for r in range(R):
        b = int(rois[r, 0])
        x0 = rois[r, 1] * spatial_scale / (W - 1)
        y0 = rois[r, 2] * spatial_scale / (H - 1)
        x1 = rois[r, 3] * spatial_scale / (W - 1)
        y1 = rois[r, 4] * spatial_scale / (H - 1)
        for i in range(crop_height):
            if crop_height > 1:
                in_y = y0 * (H - 1) + i * (y1 - y0) * (H - 1) / (crop_height - 1)
            else:
                in_y = 0.5 * (y0 + y1) * (H - 1)
            if in_y < 0 or in_y > H - 1:
                continue
            top, bot = int(np.floor(in_y)), int(np.ceil(in_y))
            yl = in_y - top
            for j in range(crop_width):
                if crop_width > 1:
                    in_x = x0 * (W - 1) + j * (x1 - x0) * (W - 1) / (crop_width - 1)
                else:
                    in_x = 0.5 * (x0 + x1) * (W - 1)
                if in_x < 0 or in_x > W - 1:
                    continue
                left, right = int(np.floor(in_x)), int(np.ceil(in_x))
                xl = in_x - left
                tv = feats[b, :, top, left] * (1 - xl) + feats[b, :, top, right] * xl
                bv = feats[b, :, bot, left] * (1 - xl) + feats[b, :, bot, right] * xl
                out[r, :, i, j] = tv * (1 - yl) + bv * yl
    return out


if __name__ == "__main__":
    key = jax.random.PRNGKey(0)
    B, C, H, W = 2, 4, 16, 16
    crop_h, crop_w, spatial_scale = 7, 7, 1.0

    features = jax.random.normal(key, (B, C, H, W), dtype=jnp.float32)   # NCHW, like PyTorch
    rois = jnp.array([
        [0.0,  2.5,  3.0, 12.0, 14.0],
        [1.0,  0.0,  0.0, 15.0, 15.0],
        [0.0,  5.2,  1.7,  9.9,  8.3],
        [1.0, -2.3,  4.1, 18.7, 11.6],   # partially out of bounds -> extrapolation zeros
    ], dtype=jnp.float32)

    out = roi_align(features, rois, crop_h, crop_w, spatial_scale)
    out = jax.block_until_ready(out)

    ref = _reference(np.asarray(features), np.asarray(rois), crop_h, crop_w, spatial_scale)
    np.testing.assert_allclose(np.asarray(out, np.float64), ref, atol=2e-3, rtol=2e-3)
    print("KERNEL_OK")
</pallas_src>

<mosaic_0001>
module attributes {stable_mosaic.version = 11 : i64} {
  func.func @_roi_align_group_kernel(%arg0: i32, %arg1: memref<2xi32, #tpu.memory_space<smem>>, %arg2: memref<1x64x16xf32, #tpu.memory_space<vmem>>, %arg3: memref<1x8x64x128xf32, #tpu.memory_space<vmem>>, %arg4: memref<1x16x64xf32, #tpu.memory_space<vmem>>, %arg5: memref<1x64x128xf32, #tpu.memory_space<vmem>>) attributes {dimension_semantics = [#tpu.dimension_semantics<parallel>], iteration_bounds = array<i64: 2>, scalar_prefetch = 1 : i64, scratch_operands = 0 : i64, tpu.core_type = #tpu.core_type<tc>, window_params = [{transform_indices = @transform_0, window_bounds = array<i64: 1, 64, 16>}, {transform_indices = @transform_1, window_bounds = array<i64: 1, 8, 64, 128>}, {transform_indices = @transform_2, window_bounds = array<i64: 1, 16, 64>}, {transform_indices = @transform_3, window_bounds = array<i64: 1, 64, 128>}]} {
    %c0 = arith.constant 0 : index
    %c0_0 = arith.constant 0 : index
    %c0_1 = arith.constant 0 : index
    %0 = vector.load %arg2[%c0, %c0_0, %c0_1] : memref<1x64x16xf32, #tpu.memory_space<vmem>>, vector<1x64x16xf32>
    %1 = vector.shape_cast %0 : vector<1x64x16xf32> to vector<64x16xf32>
    %c0_2 = arith.constant 0 : index
    %c0_3 = arith.constant 0 : index
    %c0_4 = arith.constant 0 : index
    %2 = vector.load %arg4[%c0_2, %c0_3, %c0_4] : memref<1x16x64xf32, #tpu.memory_space<vmem>>, vector<1x16x64xf32>
    %3 = vector.shape_cast %2 : vector<1x16x64xf32> to vector<16x64xf32>
    %cst = arith.constant dense<0.000000e+00> : vector<64x64xf32>
    %4 = tpu.matmul %1, %3, %cst {dimension_numbers = #tpu.dot_dimension_numbers<[1], [0], [0], [1], [0, 0, 1, 1], [], []>} : vector<64x16xf32>, vector<16x64xf32>, vector<64x64xf32> -> vector<64x64xf32>
    %5 = vector.extract_strided_slice %4 {offsets = [0, 0], sizes = [8, 64], strides = [1, 1]} : vector<64x64xf32> to vector<8x64xf32>
    %c0_5 = arith.constant 0 : index
    %c0_6 = arith.constant 0 : index
    %c0_7 = arith.constant 0 : index
    %c0_8 = arith.constant 0 : index
    %6 = vector.load %arg3[%c0_5, %c0_6, %c0_7, %c0_8] : memref<1x8x64x128xf32, #tpu.memory_space<vmem>>, vector<1x1x64x128xf32>
    %7 = vector.shape_cast %6 : vector<1x1x64x128xf32> to vector<64x128xf32>
    %cst_9 = arith.constant dense<0.000000e+00> : vector<8x128xf32>
    %8 = tpu.matmul %5, %7, %cst_9 {dimension_numbers = #tpu.dot_dimension_numbers<[1], [0], [0], [1], [0, 0, 1, 1], [], []>} : vector<8x64xf32>, vector<64x128xf32>, vector<8x128xf32> -> vector<8x128xf32>
    %c0_10 = arith.constant 0 : index
    %c0_11 = arith.constant 0 : index
    %c0_12 = arith.constant 0 : index
    %9 = vector.load %arg5[%c0_10, %c0_11, %c0_12] : memref<1x64x128xf32, #tpu.memory_space<vmem>>, vector<1x8x128xf32>
    %10 = vector.shape_cast %9 : vector<1x8x128xf32> to vector<8x128xf32>
    %11 = vector.shape_cast %8 : vector<8x128xf32> to vector<1x8x128xf32>
    tpu.vector_store %arg5[%c0_10, %c0_11, %c0_12], %11 {strides = array<i32>} : memref<1x64x128xf32, #tpu.memory_space<vmem>>, vector<1x8x128xf32>,
    %12 = vector.extract_strided_slice %4 {offsets = [8, 0], sizes = [8, 64], strides = [1, 1]} : vector<64x64xf32> to vector<8x64xf32>
    %c0_13 = arith.constant 0 : index
    %c1 = arith.constant 1 : index
    %c0_14 = arith.constant 0 : index
    %c0_15 = arith.constant 0 : index
    %13 = vector.load %arg3[%c0_13, %c1, %c0_14, %c0_15] : memref<1x8x64x128xf32, #tpu.memory_space<vmem>>, vector<1x1x64x128xf32>
    %14 = vector.shape_cast %13 : vector<1x1x64x128xf32> to vector<64x128xf32>
    %cst_16 = arith.constant dense<0.000000e+00> : vector<8x128xf32>
    %15 = tpu.matmul %12, %14, %cst_16 {dimension_numbers = #tpu.dot_dimension_numbers<[1], [0], [0], [1], [0, 0, 1, 1], [], []>} : vector<8x64xf32>, vector<64x128xf32>, vector<8x128xf32> -> vector<8x128xf32>
    %c0_17 = arith.constant 0 : index
    %c8 = arith.constant 8 : index
    %c0_18 = arith.constant 0 : index
    %16 = vector.load %arg5[%c0_17, %c8, %c0_18] : memref<1x64x128xf32, #tpu.memory_space<vmem>>, vector<1x8x128xf32>
    %17 = vector.shape_cast %16 : vector<1x8x128xf32> to vector<8x128xf32>
    %18 = vector.shape_cast %15 : vector<8x128xf32> to vector<1x8x128xf32>
    tpu.vector_store %arg5[%c0_17, %c8, %c0_18], %18 {strides = array<i32>} : memref<1x64x128xf32, #tpu.memory_space<vmem>>, vector<1x8x128xf32>,
    %19 = vector.extract_strided_slice %4 {offsets = [16, 0], sizes = [8, 64], strides = [1, 1]} : vector<64x64xf32> to vector<8x64xf32>
    %c0_19 = arith.constant 0 : index
    %c2 = arith.constant 2 : index
    %c0_20 = arith.constant 0 : index
    %c0_21 = arith.constant 0 : index
    %20 = vector.load %arg3[%c0_19, %c2, %c0_20, %c0_21] : memref<1x8x64x128xf32, #tpu.memory_space<vmem>>, vector<1x1x64x128xf32>
    %21 = vector.shape_cast %20 : vector<1x1x64x128xf32> to vector<64x128xf32>
    %cst_22 = arith.constant dense<0.000000e+00> : vector<8x128xf32>
    %22 = tpu.matmul %19, %21, %cst_22 {dimension_numbers = #tpu.dot_dimension_numbers<[1], [0], [0], [1], [0, 0, 1, 1], [], []>} : vector<8x64xf32>, vector<64x128xf32>, vector<8x128xf32> -> vector<8x128xf32>
    %c0_23 = arith.constant 0 : index
    %c16 = arith.constant 16 : index
    %c0_24 = arith.constant 0 : index
    %23 = vector.load %arg5[%c0_23, %c16, %c0_24] : memref<1x64x128xf32, #tpu.memory_space<vmem>>, vector<1x8x128xf32>
    %24 = vector.shape_cast %23 : vector<1x8x128xf32> to vector<8x128xf32>
    %25 = vector.shape_cast %22 : vector<8x128xf32> to vector<1x8x128xf32>
    tpu.vector_store %arg5[%c0_23, %c16, %c0_24], %25 {strides = array<i32>} : memref<1x64x128xf32, #tpu.memory_space<vmem>>, vector<1x8x128xf32>,
    %26 = vector.extract_strided_slice %4 {offsets = [24, 0], sizes = [8, 64], strides = [1, 1]} : vector<64x64xf32> to vector<8x64xf32>
    %c0_25 = arith.constant 0 : index
    %c3 = arith.constant 3 : index
    %c0_26 = arith.constant 0 : index
    %c0_27 = arith.constant 0 : index
    %27 = vector.load %arg3[%c0_25, %c3, %c0_26, %c0_27] : memref<1x8x64x128xf32, #tpu.memory_space<vmem>>, vector<1x1x64x128xf32>
    %28 = vector.shape_cast %27 : vector<1x1x64x128xf32> to vector<64x128xf32>
    %cst_28 = arith.constant dense<0.000000e+00> : vector<8x128xf32>
    %29 = tpu.matmul %26, %28, %cst_28 {dimension_numbers = #tpu.dot_dimension_numbers<[1], [0], [0], [1], [0, 0, 1, 1], [], []>} : vector<8x64xf32>, vector<64x128xf32>, vector<8x128xf32> -> vector<8x128xf32>
    %c0_29 = arith.constant 0 : index
    %c24 = arith.constant 24 : index
    %c0_30 = arith.constant 0 : index
    %30 = vector.load %arg5[%c0_29, %c24, %c0_30] : memref<1x64x128xf32, #tpu.memory_space<vmem>>, vector<1x8x128xf32>
    %31 = vector.shape_cast %30 : vector<1x8x128xf32> to vector<8x128xf32>
    %32 = vector.shape_cast %29 : vector<8x128xf32> to vector<1x8x128xf32>
    tpu.vector_store %arg5[%c0_29, %c24, %c0_30], %32 {strides = array<i32>} : memref<1x64x128xf32, #tpu.memory_space<vmem>>, vector<1x8x128xf32>,
    %33 = vector.extract_strided_slice %4 {offsets = [32, 0], sizes = [8, 64], strides = [1, 1]} : vector<64x64xf32> to vector<8x64xf32>
    %c0_31 = arith.constant 0 : index
    %c4 = arith.constant 4 : index
    %c0_32 = arith.constant 0 : index
    %c0_33 = arith.constant 0 : index
    %34 = vector.load %arg3[%c0_31, %c4, %c0_32, %c0_33] : memref<1x8x64x128xf32, #tpu.memory_space<vmem>>, vector<1x1x64x128xf32>
    %35 = vector.shape_cast %34 : vector<1x1x64x128xf32> to vector<64x128xf32>
    %cst_34 = arith.constant dense<0.000000e+00> : vector<8x128xf32>
    %36 = tpu.matmul %33, %35, %cst_34 {dimension_numbers = #tpu.dot_dimension_numbers<[1], [0], [0], [1], [0, 0, 1, 1], [], []>} : vector<8x64xf32>, vector<64x128xf32>, vector<8x128xf32> -> vector<8x128xf32>
    %c0_35 = arith.constant 0 : index
    %c32 = arith.constant 32 : index
    %c0_36 = arith.constant 0 : index
    %37 = vector.load %arg5[%c0_35, %c32, %c0_36] : memref<1x64x128xf32, #tpu.memory_space<vmem>>, vector<1x8x128xf32>
    %38 = vector.shape_cast %37 : vector<1x8x128xf32> to vector<8x128xf32>
    %39 = vector.shape_cast %36 : vector<8x128xf32> to vector<1x8x128xf32>
    tpu.vector_store %arg5[%c0_35, %c32, %c0_36], %39 {strides = array<i32>} : memref<1x64x128xf32, #tpu.memory_space<vmem>>, vector<1x8x128xf32>,
    %40 = vector.extract_strided_slice %4 {offsets = [40, 0], sizes = [8, 64], strides = [1, 1]} : vector<64x64xf32> to vector<8x64xf32>
    %c0_37 = arith.constant 0 : index
    %c5 = arith.constant 5 : index
    %c0_38 = arith.constant 0 : index
    %c0_39 = arith.constant 0 : index
    %41 = vector.load %arg3[%c0_37, %c5, %c0_38, %c0_39] : memref<1x8x64x128xf32, #tpu.memory_space<vmem>>, vector<1x1x64x128xf32>
    %42 = vector.shape_cast %41 : vector<1x1x64x128xf32> to vector<64x128xf32>
    %cst_40 = arith.constant dense<0.000000e+00> : vector<8x128xf32>
    %43 = tpu.matmul %40, %42, %cst_40 {dimension_numbers = #tpu.dot_dimension_numbers<[1], [0], [0], [1], [0, 0, 1, 1], [], []>} : vector<8x64xf32>, vector<64x128xf32>, vector<8x128xf32> -> vector<8x128xf32>
    %c0_41 = arith.constant 0 : index
    %c40 = arith.constant 40 : index
    %c0_42 = arith.constant 0 : index
    %44 = vector.load %arg5[%c0_41, %c40, %c0_42] : memref<1x64x128xf32, #tpu.memory_space<vmem>>, vector<1x8x128xf32>
    %45 = vector.shape_cast %44 : vector<1x8x128xf32> to vector<8x128xf32>
    %46 = vector.shape_cast %43 : vector<8x128xf32> to vector<1x8x128xf32>
    tpu.vector_store %arg5[%c0_41, %c40, %c0_42], %46 {strides = array<i32>} : memref<1x64x128xf32, #tpu.memory_space<vmem>>, vector<1x8x128xf32>,
    %47 = vector.extract_strided_slice %4 {offsets = [48, 0], sizes = [8, 64], strides = [1, 1]} : vector<64x64xf32> to vector<8x64xf32>
    %c0_43 = arith.constant 0 : index
    %c6 = arith.constant 6 : index
    %c0_44 = arith.constant 0 : index
    %c0_45 = arith.constant 0 : index
    %48 = vector.load %arg3[%c0_43, %c6, %c0_44, %c0_45] : memref<1x8x64x128xf32, #tpu.memory_space<vmem>>, vector<1x1x64x128xf32>
    %49 = vector.shape_cast %48 : vector<1x1x64x128xf32> to vector<64x128xf32>
    %cst_46 = arith.constant dense<0.000000e+00> : vector<8x128xf32>
    %50 = tpu.matmul %47, %49, %cst_46 {dimension_numbers = #tpu.dot_dimension_numbers<[1], [0], [0], [1], [0, 0, 1, 1], [], []>} : vector<8x64xf32>, vector<64x128xf32>, vector<8x128xf32> -> vector<8x128xf32>
    %c0_47 = arith.constant 0 : index
    %c48 = arith.constant 48 : index
    %c0_48 = arith.constant 0 : index
    %51 = vector.load %arg5[%c0_47, %c48, %c0_48] : memref<1x64x128xf32, #tpu.memory_space<vmem>>, vector<1x8x128xf32>
    %52 = vector.shape_cast %51 : vector<1x8x128xf32> to vector<8x128xf32>
    %53 = vector.shape_cast %50 : vector<8x128xf32> to vector<1x8x128xf32>
    tpu.vector_store %arg5[%c0_47, %c48, %c0_48], %53 {strides = array<i32>} : memref<1x64x128xf32, #tpu.memory_space<vmem>>, vector<1x8x128xf32>,
    %54 = vector.extract_strided_slice %4 {offsets = [56, 0], sizes = [8, 64], strides = [1, 1]} : vector<64x64xf32> to vector<8x64xf32>
    %c0_49 = arith.constant 0 : index
    %c7 = arith.constant 7 : index
    %c0_50 = arith.constant 0 : index
    %c0_51 = arith.constant 0 : index
    %55 = vector.load %arg3[%c0_49, %c7, %c0_50, %c0_51] : memref<1x8x64x128xf32, #tpu.memory_space<vmem>>, vector<1x1x64x128xf32>
    %56 = vector.shape_cast %55 : vector<1x1x64x128xf32> to vector<64x128xf32>
    %cst_52 = arith.constant dense<0.000000e+00> : vector<8x128xf32>
    %57 = tpu.matmul %54, %56, %cst_52 {dimension_numbers = #tpu.dot_dimension_numbers<[1], [0], [0], [1], [0, 0, 1, 1], [], []>} : vector<8x64xf32>, vector<64x128xf32>, vector<8x128xf32> -> vector<8x128xf32>
    %c0_53 = arith.constant 0 : index
    %c56 = arith.constant 56 : index
    %c0_54 = arith.constant 0 : index
    %58 = vector.load %arg5[%c0_53, %c56, %c0_54] : memref<1x64x128xf32, #tpu.memory_space<vmem>>, vector<1x8x128xf32>
    %59 = vector.shape_cast %58 : vector<1x8x128xf32> to vector<8x128xf32>
    %60 = vector.shape_cast %57 : vector<8x128xf32> to vector<1x8x128xf32>
    tpu.vector_store %arg5[%c0_53, %c56, %c0_54], %60 {strides = array<i32>} : memref<1x64x128xf32, #tpu.memory_space<vmem>>, vector<1x8x128xf32>,
    return
  }
  func.func @transform_0(%arg0: i32, %arg1: memref<2xi32, #tpu.memory_space<smem>>) -> (i32, i32, i32) {
    %c0_i32 = arith.constant 0 : i32
    %c0_i32_0 = arith.constant 0 : i32
    %c0_i32_1 = arith.constant 0 : i32
    return %arg0, %c0_i32, %c0_i32_0 : i32, i32, i32
  }
  func.func @transform_1(%arg0: i32, %arg1: memref<2xi32, #tpu.memory_space<smem>>) -> (i32, i32, i32, i32) {
    %c0_i32 = arith.constant 0 : i32
    %c0_i32_0 = arith.constant 0 : i32
    %c0_i32_1 = arith.constant 0 : i32
    %c0_i32_2 = arith.constant 0 : i32
    return %arg0, %c0_i32, %c0_i32_0, %c0_i32_1 : i32, i32, i32, i32
  }
  func.func @transform_2(%arg0: i32, %arg1: memref<2xi32, #tpu.memory_space<smem>>) -> (i32, i32, i32) {
    %0 = arith.index_cast %arg0 : i32 to index
    %1 = memref.load %arg1[%0] : memref<2xi32, #tpu.memory_space<smem>>
    %c0_i32 = arith.constant 0 : i32
    %c0_i32_0 = arith.constant 0 : i32
    %c0_i32_1 = arith.constant 0 : i32
    return %1, %c0_i32, %c0_i32_0 : i32, i32, i32
  }
  func.func @transform_3(%arg0: i32, %arg1: memref<2xi32, #tpu.memory_space<smem>>) -> (i32, i32, i32) {
    %c0_i32 = arith.constant 0 : i32
    %c0_i32_0 = arith.constant 0 : i32
    %c0_i32_1 = arith.constant 0 : i32
    return %arg0, %c0_i32, %c0_i32_0 : i32, i32, i32
  }
}

</mosaic_0001>

<bundles_post_ra>
// kernel: tpu_custom_call.1
= control target key start
LH: loop header
LB: loop body
LE: loop exit
PB: predicated region body
PF: predicated region fallthrough
CT: control target
= control target key end

     0   :  { %s2130_s0 = inlined_call_operand.vmem [shape: s32[2], index: 0, kind: input, shape index: {}]   ;;  %s2131_s1 = inlined_call_operand.vmem [shape: f32[2,64,16], index: 1, kind: input, shape index: {}]   ;;  %s2132_s2 = inlined_call_operand.hbm [shape: f32[2,8,64,128], index: 2, kind: input, shape index: {}]   ;;  %s2133_s3 = inlined_call_operand.vmem [shape: f32[2,16,64], index: 3, kind: input, shape index: {}]   ;;  %s2134_s4 = inlined_call_operand.hbm [shape: f32[2,64,128], index: 4, kind: output, shape index: {}]  }
   0x1   :  { %s9_s17 = sshll.u32 %s2130_s0, 4  ;;  %s10_s17 = int_to_ptr.vmem [resolvable:$true] %s9_s17 }
   0x2   :  { %s1656_s18 = scalar_lea.vmem %s10_s17, 16  ;;  %p1661_p1 = scmp.lt.s32.totalorder %s10_s17, %s10_s17 }
   0x3   :  { %p1657_p0 = scmp.ne.s32.totalorder %s10_s17, %s1656_s18  ;;  %p1662_p2 = scmp.lt.s32.totalorder %s1656_s18, %s1656_s18 }
   0x5   :  { %p1663_p3 = por %p1662_p2, %p1661_p1 }
   0x7   :  { %p1664_p4 = pnand %p1663_p3, %p1657_p0 }
   0x9   :  { %1667 = shalt.err (!%p1664_p4)  }
   0xa   :  { %s1768_s19 = smov [#allocation3]  }
   0xb   :  { %12 = dma.vmem_to_smem %s10_s17, 16, %s1768_s19, [#allocation2] }
   0xc   :  { %1742 = dma.done.wait [#allocation2], 16 }
   0xd   :  { %1743 = vsyncadd [#allocation2], 4294967280 }
   0xe   :  { %14 = sfence }
   0xf   :  { %15 = vsyncpa [#allocation5], 0 }
  0x10   :  { %17 = vsyncpa [#allocation5 + $0x1], 0 }
  0x11   :  { %18 = vsyncpa [#allocation6], 0 }
  0x12   :  { %20 = vsyncpa [#allocation6 + $0x1], 0  ;;  %s1806_s20 = smov 0   ;;  %s1808_s0 = smov 0  }
  0x13   :  { %s1810_s21 = smov 0   ;;  %s1812_s22 = smov 0  }
  0x14 LB: > { %s1827_s23 = sadd.s32 4294967295, %s1766_s22   ;;  %s1158_s24 = sadd.s32 4294967294, %s1766_s22   ;;  %s1766_s22 = sphi %s1812_s22, %s2147_s22   ;;  %s1762_s21 = sphi %s1810_s21, %s2146_s21   ;;  %s1758_s0 = sphi %s1808_s0, %s2145_s0   ;;  %s1754_s20 = sphi %s1806_s20, %s2144_s20  }
  0x15   : > { %s1831_s25 = sadd.s32 1, %s1766_s22   ;;  %s59_s26 = sadd.s32 1, %s1762_s21 }
  0x16   : > { %s56_s27 = ssub.s32 %s1766_s22, %s1831_s25  ;;  %p66_p5 = scmp.ne.s32.totalorder %s1762_s21, %s1758_s0 }
  0x17   : > { %p57_p6 = scmp.eq.s32.totalorder %s56_s27, 0  ;;  %p67_p7 = scmp.eq.s32.totalorder %s1766_s22, 0 }
  0x18   : > { %p72_p8 = scmp.ne.s32.totalorder %s1758_s0, %s1754_s20  ;;  %p73_p9 = scmp.eq.s32.totalorder %s1827_s23, 0 }
  0x19   : > { %s1843_s28 = scalar_select %p57_p6, %s1762_s21, %s59_s26  }
  0x1a   : > { %p1845_p10 = por %p67_p7, %p66_p5  ;;  %p1849_p11 = por %p73_p9, %p72_p8 }
  0x1b   : > { %p124_p12 = scmp.eq.s32.totalorder %s1827_s23, 1  ;;  %p130_p13 = scmp.eq.s32.totalorder %s1158_s24, 1 }
  0x1c   : > { %p1614_p1 = scmp.lt.s32.totalorder %s1766_s22, 2  ;;  %s158_s7 = sand.u32 1, %s1762_s21  }
  0x1d   : > { %p1856_p2 = por %p124_p12, %p66_p5  ;;  %p1860_p3 = por %p130_p13, %p72_p8 }
  0x1e   : > { %s1248_s8 = sshll.u32 %s1766_s22, 13  ;;  %s1161_s9 = sshll.u32 %s158_s7, 9 }
  0x1f   : > { %s2138_s5 = scalar_select %p1856_p2, 1, 0 }
  0x20   : > { %s2139_s6 = scalar_select %p1860_p3, 1, 0 }
  0x21   : > { %s1869_s12 = scalar_lea.hbm %s2132_s2, %s1248_s8  ;;  %s162_s13 = scalar_lea.vmem [#allocation4], %s1161_s9 }
  0x22   : > { %s169_s14 = sshll.u32 %s162_s13, 4  ;;  %p1873_p4 = pnand %p1614_p1, %p1845_p10  ;;  %s1877_s14 = int_to_ptr.vmem [resolvable:$true] %s169_s14 }
  0x23   : > { %s1879_s16 = scalar_lea.sflag [#allocation5], %s158_s7  ;;  %s1668_s17 = scalar_lea.hbm %s1869_s12, 8192 }
  0x24   : > { %p1669_p5 = scmp.ne.s32.totalorder %s1869_s12, %s1668_s17  ;;  %p1670_p6 = pneg %p1873_p4 }
  0x25   : > { %s1673_s24 = scalar_lea.hbm %s2132_s2, 16384  ;;  %p1674_p9 = scmp.lt.u32.totalorder %s1869_s12, %s2132_s2 }
  0x26   : > { %p1671_p7 = pnand %p1670_p6, %p1669_p5  ;;  %p1675_p10 = scmp.lt.u32.totalorder %s1673_s24, %s1668_s17 }
  0x27   : > { %p1677_p13 = scmp.lt.u32.totalorder %s1668_s17, %s1869_s12 }
  0x28   : > { %p1672_p8 = pneg %p1671_p7  ;;  %p1676_p12 = por %p1675_p10, %p1674_p9 }
  0x2a   : > { %p1678_p1 = por %p1677_p13, %p1676_p12 }
  0x2c   : > { %p1679_p0 = pnand %p1678_p1, %p1672_p8 }
  0x2e   : > { %1682 = shalt.err (!%p1679_p0)
}
  0x2f   : > { %s1683_s29 = scalar_lea.vmem %s1877_s14, 8192  ;;  %s1769_s7 = smov [#allocation4]  }
  0x30   : > { %p1684_p5 = scmp.ne.s32.totalorder %s1877_s14, %s1683_s29  ;;  %s1688_s8 = sshll.u32 %s1769_s7, 4  ;;  %s1689_s8 = int_to_ptr.vmem [resolvable:$false] %s1688_s8 }
  0x31   : > { %s1690_s9 = scalar_lea.vmem %s1689_s8, 16384  ;;  %p1691_p2 = scmp.lt.s32.totalorder %s1877_s14, %s1689_s8 }
  0x32   : > { %p1686_p7 = pnand %p1684_p5, %p1670_p6  ;;  %p1692_p9 = scmp.lt.s32.totalorder %s1690_s9, %s1683_s29 }
  0x34   : > { %p1687_p3 = pneg %p1686_p7  ;;  %p1693_p10 = por %p1692_p9, %p1691_p2 }
  0x36   : > { %p1694_p12 = pnand %p1693_p10, %p1687_p3 }
  0x38   : > { %1697 = shalt.err (!%p1694_p12)
}
  0x39   : > { %s1770_s10 = smov 128   ;;  %s1771_s11 = smov 8  }
  0x3a   : > { %1609 = dma.hbm_to_vmem [thread:$0]  (!%p1873_p4), %s1869_s12, 8192, %s1877_s14, %s1879_s16, %s1770_s10, %s1770_s10, %s1771_s11  }
  0x3b   : > { %p1164_p0 = scmp.ge.s32.totalorder %s1766_s22, 1  ;;  %p187_p6 = scmp.lt.s32.totalorder %s1766_s22, 3 }
  0x3d   : > { %p188_p8 = pnand %p1164_p0, %p187_p6 }
  0x3e   : > { %s1910_s13 = sand.u32 (!%p188_p8), 1, %s1758_s0  }
  0x3f   : > { %191 = sbr.rel (%p188_p8) target bundleno = 577 (0x241), region = 32  ;;  %s1165_s17 = sshll.u32 (!%p188_p8), %s1910_s13, 9 }
  0x40   : > { %s194_s18 = scalar_lea.sflag (!%p188_p8), [#allocation5], %s1910_s13  ;;  %s1914_s19 = scalar_lea.vmem (!%p188_p8), [#allocation4], %s1165_s17 }
  0x46   : > { %1745 = dma.done.wait (%p1849_p11), %s194_s18, 8192  }
  0x47   : > { %1747 = vsyncadd (%p1849_p11), %s194_s18, 4294959104  ;;  %p231_p2 = scmp.lt.s32.totalorder %s1827_s23, 1  ;;  %s236_s12 = sld [smem:[#allocation3 + %s1827_s23]]  ;;  %v1772_v0 = vmov 0.0|0.0   ;;  %vm253_vm0 = vcmask 130048   ;;  %v383_v2 = vld [vmem:[%s1914_s19] sm:$0xff] }
  0x48   : > { %1506 = vmatprep.subr.bf16.mxu1 %v1772_v0  ;;  %v384_v3 = vld [vmem:[%s1914_s19 + $0x8] sm:$0xff]  ;;  %v385_v5 = vld [vmem:[%s1914_s19 + $0x10] sm:$0xff]  ;;  %v386_v6 = vld [vmem:[%s1914_s19 + $0x18] sm:$0xff]  ;;  %vm1773_vm1 = vmmov 0   ;;  %v1774_v36 = vmov 0.0   ;;  %vm391_vm2 = vcmask 523264  }
  0x49   : > { %s232_s14 = scalar_select %p231_p2, %s1827_s23, 1  ;;  %v1507_v4 = vpack.c.bf16 %v384_v3, %v383_v2  ;;  %v1510_v9 = vpack.c.bf16 %v386_v6, %v385_v5  ;;  %v1180_v11 = vld [vmem:[%s1914_s19 + $0x40] sm:$0xff]  ;;  %v1181_v12 = vld [vmem:[%s1914_s19 + $0x48] sm:$0xff]  ;;  %v1182_v18 = vld [vmem:[%s1914_s19 + $0x50] sm:$0xff]  ;;  %1366 = vmatprep.mubr.msk.f32.mxu1 %vm1773_vm1, %v1774_v36 }
  0x4a   : > { %v387_v13 = vld [vmem:[%s1914_s19 + $0x20] sm:$0xff]  ;;  %v388_v14 = vld [vmem:[%s1914_s19 + $0x28] sm:$0xff]  ;;  %v1519_v16 = vpack.c.bf16 %v1181_v12, %v1180_v11  ;;  %v1183_v19 = vld [vmem:[%s1914_s19 + $0x58] sm:$0xff]  ;;  %s1166_s8 = sshll.u32 %s1910_s13, 6  ;;  %s1251_s11 = sshll.u32 %s1827_s23, 10 }
  0x4b   : > { %s1249_s15 = sshll.u32 %s232_s14, 6  ;;  %1508 = vmatpush3.bf16.msra.mxu1 %v1507_v4  ;;  %v1513_v20 = vpack.c.bf16 %v388_v14, %v387_v13  ;;  %v389_v21 = vld [vmem:[%s1914_s19 + $0x30] sm:$0xff]  ;;  %v390_v22 = vld [vmem:[%s1914_s19 + $0x38] sm:$0xff]  ;;  %v1522_v24 = vpack.c.bf16 %v1183_v19, %v1182_v18  ;;  %v1184_v26 = vld [vmem:[%s1914_s19 + $0x60] sm:$0xff]  ;;  %s230_s9 = scalar_lea.vmem [#allocation7], %s1166_s8 }
  0x4c   : > { %s1927_s26 = scalar_lea.vmem %s2131_s1, %s1249_s15  ;;  %1509 = vmatprep.subr.bf16.mxu1 %v1772_v0  ;;  %v1185_v27 = vld [vmem:[%s1914_s19 + $0x68] sm:$0xff]  ;;  %v1516_v28 = vpack.c.bf16 %v390_v22, %v389_v21  ;;  %v1186_v32 = vld [vmem:[%s1914_s19 + $0x70] sm:$0xff]  ;;  %v1187_v33 = vld [vmem:[%s1914_s19 + $0x78] sm:$0xff]  ;;  %s1061_s10 = sshll.u32 %s230_s9, 4  ;;  %s2081_s10 = int_to_ptr.vmem [resolvable:$true] %s1061_s10 }
  0x4d   : > { %p237_p11 = scmp.lt.s32.totalorder %s236_s12, 1  ;;  %v243_v1 = vld [vmem:[%s1927_s26] sm:$0xff]  ;;  %v244_v15 = vld [vmem:[%s1927_s26 + $0x8] sm:$0xff]  ;;  %v245_v17 = vld [vmem:[%s1927_s26 + $0x10] sm:$0xff]  ;;  %v1525_v30 = vpack.c.bf16 %v1185_v27, %v1184_v26  ;;  %v1528_v35 = vpack.c.bf16 %v1187_v33, %v1186_v32  ;;  %s1698_s14 = scalar_lea.vmem %s2081_s10, 1024 }
  0x4e   : > { %1338 = vmatprep.mubr.msk.f32.mxu0 %vm253_vm0, %v243_v1  ;;  %v246_v23 = vld [vmem:[%s1927_s26 + $0x18] sm:$0xff]  ;;  %v247_v25 = vld [vmem:[%s1927_s26 + $0x20] sm:$0xff]  ;;  %v248_v29 = vld [vmem:[%s1927_s26 + $0x28] sm:$0xff]  ;;  %p1699_p3 = scmp.ne.s32.totalorder %s2081_s10, %s1698_s14  ;;  %p2141_p4 = scmp.ne.s32.totalorder %s2138_s5, 0 }
  0x4f   : > { %s2149_s12 = smov (!%p237_p11, %s236_s12), 1  ;;  %1511 = vmatpush3.bf16.msra.mxu1 %v1510_v9  ;;  %v249_v31 = vld [vmem:[%s1927_s26 + $0x30] sm:$0xff]  ;;  %v250_v34 = vld [vmem:[%s1927_s26 + $0x38] sm:$0xff]  ;;  %v1198_v37 = vld [vmem:[%s1914_s19 + $0xc0] sm:$0xff]  ;;  %s1775_s23 = smov [#allocation7]  }
  0x50   : > { %s1250_s30 = sshll.u32 %s2149_s12, 4  ;;  %1512 = vmatprep.subr.bf16.mxu1 %v1772_v0  ;;  %v1199_v38 = vld [vmem:[%s1914_s19 + $0xc8] sm:$0xff]  ;;  %v1189_v39 = vld [vmem:[%s1914_s19 + $0x80] sm:$0xff]  ;;  %v1200_v43 = vld [vmem:[%s1914_s19 + $0xd0] sm:$0xff]  ;;  %s1048_s12 = scalar_lea.sflag [#allocation6], %s1910_s13 }
  0x51   : > { %s241_s7 = scalar_lea.vmem %s2133_s3, %s1250_s30  ;;  %v1190_v40 = vld [vmem:[%s1914_s19 + $0x88] sm:$0xff]  ;;  %v1543_v41 = vpack.c.bf16 %v1199_v38, %v1198_v37  ;;  %v1201_v44 = vld [vmem:[%s1914_s19 + $0xd8] sm:$0xff]  ;;  %v1191_v46 = vld [vmem:[%s1914_s19 + $0x90] sm:$0xff]  ;;  %p1700_p13 = pnand %p1699_p3, %p2141_p4 }
  0x52   : > { %v251_v7 = vld [vmem:[%s241_s7] sm:$0xff]  ;;  %v252_v8 = vld [vmem:[%s241_s7 + $0x8] sm:$0xff]  ;;  %v1531_v42 = vpack.c.bf16 %v1190_v40, %v1189_v39  ;;  %v1192_v47 = vld [vmem:[%s1914_s19 + $0x98] sm:$0xff]  ;;  %v1546_v49 = vpack.c.bf16 %v1201_v44, %v1200_v43  ;;  %s1702_s15 = sshll.u32 %s1775_s23, 4  ;;  %s1703_s15 = int_to_ptr.vmem [resolvable:$false] %s1702_s15 }
  0x53   : > { %v1502_v10 = vpack.c.bf16 %v252_v8, %v251_v7  ;;  %1514 = vmatpush3.bf16.msra.mxu1 %v1513_v20  ;;  %v1534_v50 = vpack.c.bf16 %v1192_v47, %v1191_v46  ;;  %v1202_v51 = vld [vmem:[%s1914_s19 + $0xe0] sm:$0xff]  ;;  %v1203_v52 = vld [vmem:[%s1914_s19 + $0xe8] sm:$0xff]  ;;  %v1204_v59 = vld [vmem:[%s1914_s19 + $0xf0] sm:$0xff]  ;;  %p1701_p1 = pneg %p1700_p13  ;;  %s1704_s16 = scalar_lea.vmem %s1703_s15, 2048 }
  0x54   : > { %1515 = vmatprep.subr.bf16.mxu1 %v1772_v0  ;;  %v1193_v53 = vld [vmem:[%s1914_s19 + $0xa0] sm:$0xff]  ;;  %v1194_v54 = vld [vmem:[%s1914_s19 + $0xa8] sm:$0xff]  ;;  %v1549_v57 = vpack.c.bf16 %v1203_v52, %v1202_v51  ;;  %v1205_v60 = vld [vmem:[%s1914_s19 + $0xf8] sm:$0xff]  ;;  %p1705_p5 = scmp.lt.s32.totalorder %s2081_s10, %s1703_s15  ;;  %p1706_p7 = scmp.lt.s32.totalorder %s1704_s16, %s1698_s14 }
  0x55   : > { %1503 = vmatprep.subr.bf16.mxu0 %v1502_v10  ;;  %v1537_v58 = vpack.c.bf16 %v1194_v54, %v1193_v53  ;;  %v1195_v61 = vld [vmem:[%s1914_s19 + $0xb0] sm:$0xff]  ;;  %v1196_v62 = vld [vmem:[%s1914_s19 + $0xb8] sm:$0xff]  ;;  %v1552_v2 = vpack.c.bf16 %v1205_v60, %v1204_v59  ;;  %v1216_v4 = vld [vmem:[%s1914_s19 + $0x140] sm:$0xff] }
  0x56   : > { %1505 = vmatpush3.bf16.msra.mxu0 %v1502_v10  ;;  %v1540_v3 = vpack.c.bf16 %v1196_v62, %v1195_v61  ;;  %v1217_v5 = vld [vmem:[%s1914_s19 + $0x148] sm:$0xff]  ;;  %v1207_v6 = vld [vmem:[%s1914_s19 + $0x100] sm:$0xff]  ;;  %v1218_v12 = vld [vmem:[%s1914_s19 + $0x150] sm:$0xff]  ;;  %p1707_p9 = por %p1706_p7, %p1705_p5 }
  0x57   : > { %1518 = vmatprep.subr.bf16.mxu0 %v1772_v0  ;;  %1517 = vmatpush3.bf16.msra.mxu1 %v1516_v28  ;;  %v1208_v7 = vld [vmem:[%s1914_s19 + $0x108] sm:$0xff]  ;;  %v1567_v10 = vpack.c.bf16 %v1217_v5, %v1216_v4  ;;  %v1219_v13 = vld [vmem:[%s1914_s19 + $0x158] sm:$0xff]  ;;  %v1209_v14 = vld [vmem:[%s1914_s19 + $0x110] sm:$0xff] }
  0x58   : > { %1530 = vmatprep.subr.bf16.mxu1 %v1772_v0  ;;  %v1555_v11 = vpack.c.bf16 %v1208_v7, %v1207_v6  ;;  %v1220_v18 = vld [vmem:[%s1914_s19 + $0x160] sm:$0xff]  ;;  %v1221_v19 = vld [vmem:[%s1914_s19 + $0x168] sm:$0xff]  ;;  %v1213_v26 = vld [vmem:[%s1914_s19 + $0x130] sm:$0xff]  ;;  %p1708_p10 = pnand %p1707_p9, %p1701_p1 }
  0x59   : > { %1339 = vmatmul.mubr.msk.f32.vlgmr.msra.gmra.mrb[0].mxu0 %vm253_vm0, %v244_v15  ;;  %v1210_v15 = vld [vmem:[%s1914_s19 + $0x118] sm:$0xff]  ;;  %v1211_v20 = vld [vmem:[%s1914_s19 + $0x120] sm:$0xff]  ;;  %v1212_v21 = vld [vmem:[%s1914_s19 + $0x128] sm:$0xff]  ;;  %v1573_v22 = vpack.c.bf16 %v1221_v19, %v1220_v18 }
  0x5a   : > { %1341 = vmatprep.mubr.msk.f32.mxu0 %vm253_vm0, %v245_v17  ;;  %1520 = vmatpush3.bf16.msra.mxu0 %v1519_v16  ;;  %v1570_v16 = vpack.c.bf16 %v1219_v13, %v1218_v12  ;;  %v1558_v17 = vpack.c.bf16 %v1210_v15, %v1209_v14  ;;  %v1214_v27 = vld [vmem:[%s1914_s19 + $0x138] sm:$0xff]  ;;  %v1225_v32 = vld [vmem:[%s1914_s19 + $0x180] sm:$0xff]  ;;  %v1226_v33 = vld [vmem:[%s1914_s19 + $0x188] sm:$0xff] }
  0x5b   : > { %1521 = vmatprep.subr.bf16.mxu0 %v1772_v0  ;;  %v1236_v37 = vld [vmem:[%s1914_s19 + $0x1d0] sm:$0xff]  ;;  %v1237_v38 = vld [vmem:[%s1914_s19 + $0x1d8] sm:$0xff]  ;;  %v1238_v43 = vld [vmem:[%s1914_s19 + $0x1e0] sm:$0xff] }
  0x5c   : > { %v1227_v39 = vld [vmem:[%s1914_s19 + $0x190] sm:$0xff]  ;;  %v1228_v40 = vld [vmem:[%s1914_s19 + $0x198] sm:$0xff]  ;;  %v1239_v44 = vld [vmem:[%s1914_s19 + $0x1e8] sm:$0xff] }
  0x5d   : > { %1342 = vmatmul.mubr.msk.f32.gmra.mrb[2].mxu0 %vm253_vm0, %v246_v23  ;;  %v1561_v23 = vpack.c.bf16 %v1212_v21, %v1211_v20  ;;  %v1230_v46 = vld [vmem:[%s1914_s19 + $0x1a8] sm:$0xff]  ;;  %v1597_v47 = vpack.c.bf16 %v1239_v44, %v1238_v43  ;;  %v1231_v51 = vld [vmem:[%s1914_s19 + $0x1b0] sm:$0xff]  ;;  %v1232_v52 = vld [vmem:[%s1914_s19 + $0x1b8] sm:$0xff] }
  0x5e   : > { %1344 = vmatprep.mubr.msk.f32.mxu0 %vm253_vm0, %v247_v25  ;;  %1523 = vmatpush3.bf16.msra.mxu0 %v1522_v24  ;;  %v1222_v24 = vld [vmem:[%s1914_s19 + $0x170] sm:$0xff]  ;;  %v1223_v25 = vld [vmem:[%s1914_s19 + $0x178] sm:$0xff]  ;;  %v1588_v54 = vpack.c.bf16 %v1232_v52, %v1231_v51 }
  0x5f   : > { %1524 = vmatprep.subr.bf16.mxu0 %v1772_v0  ;;  %v1576_v28 = vpack.c.bf16 %v1223_v25, %v1222_v24 }
  0x61   : > { %1345 = vmatmul.mubr.msk.f32.gmra.mrb[4].mxu0 %vm253_vm0, %v248_v29  ;;  %v1564_v29 = vpack.c.bf16 %v1214_v27, %v1213_v26 }
  0x62   : > { %1347 = vmatprep.mubr.msk.f32.mxu0 %vm253_vm0, %v249_v31  ;;  %1526 = vmatpush3.bf16.msra.mxu0 %v1525_v30  ;;  %v1234_v30 = vld [vmem:[%s1914_s19 + $0x1c0] sm:$0xff]  ;;  %v1235_v31 = vld [vmem:[%s1914_s19 + $0x1c8] sm:$0xff] }
  0x63   : > { %1527 = vmatprep.subr.bf16.mxu0 %v1772_v0 }
  0x65   : > { %1348 = vmatmul.mubr.msk.f32.gmra.mrb[6].mxu0 %vm253_vm0, %v250_v34  ;;  %v1591_v34 = vpack.c.bf16 %v1235_v31, %v1234_v30 }
  0x66   : > { %1529 = vmatpush3.bf16.msra.mxu0 %v1528_v35  ;;  %1385 = vmatprep.mubr.msk.f32.mxu0 %vm1773_vm1, %v1774_v36  ;;  %v1579_v35 = vpack.c.bf16 %v1226_v33, %v1225_v32 }
  0x67   : > { %1542 = vmatprep.subr.bf16.mxu0 %v1772_v0 }
 0x12c   : > { %v1340_v45 = vpop.f32.mrb[0].mxu0 }
 0x12d   : > { %v344_v48 = vpop.f32.mrb[1].mxu0  ;;  %1386 = vmatmul.mubr.msk.f32.vlgmr.msra.gmra.mrb[8].mxu0 %vm391_vm2, %v1340_v45  ;;  %v1229_v45 = vld [vmem:[%s1914_s19 + $0x1a0] sm:$0xff] }
 0x12e   : > { %1544 = vmatpush3.bf16.msra.mxu0 %v1543_v41  ;;  %1367 = vmatmul.mubr.msk.f32.vlgmr.msra.gmra.mrb[0].mxu1 %vm391_vm2, %v344_v48  ;;  %v1594_v41 = vpack.c.bf16 %v1237_v38, %v1236_v37  ;;  %v1585_v48 = vpack.c.bf16 %v1230_v46, %v1229_v45 }
 0x12f   : > { %1532 = vmatpush3.bf16.msra.mxu1 %v1531_v42  ;;  %1545 = vmatprep.subr.bf16.mxu0 %v1772_v0  ;;  %v1582_v42 = vpack.c.bf16 %v1228_v40, %v1227_v39 }
 0x130   : > { %1533 = vmatprep.subr.bf16.mxu1 %v1772_v0  ;;  %v1343_v55 = vpop.f32.mrb[2].mxu0  ;;  %1423 = vmatprep.mubr.msk.f32.mxu0 %vm1773_vm1, %v1774_v36 }
 0x131   : > { %v354_v56 = vpop.f32.mrb[3].mxu0  ;;  %1404 = vmatprep.mubr.msk.f32.mxu1 %vm1773_vm1, %v1774_v36 }
 0x132   : > { %1547 = vmatpush3.bf16.msra.mxu0 %v1546_v49  ;;  %v1240_v49 = vld [vmem:[%s1914_s19 + $0x1f0] sm:$0xff] }
 0x133   : > { %1535 = vmatpush3.bf16.msra.mxu1 %v1534_v50  ;;  %1548 = vmatprep.subr.bf16.mxu0 %v1772_v0  ;;  %v1241_v50 = vld [vmem:[%s1914_s19 + $0x1f8] sm:$0xff]  ;;  %s2086_s19 = scalar_lea.hbm %s2134_s4, %s1251_s11 }
 0x134   : > { %1536 = vmatprep.subr.bf16.mxu1 %v1772_v0  ;;  %v2003_v63 = vpop.f32.mrb[4].mxu0  ;;  %v1600_v53 = vpack.c.bf16 %v1241_v50, %v1240_v49 }
 0x135   : > { %v2005_v1 = vpop.f32.mrb[5].mxu0 }
 0x136   : > { %1550 = vmatpush3.bf16.msra.mxu0 %v1549_v57 }
 0x137   : > { %1538 = vmatpush3.bf16.msra.mxu1 %v1537_v58  ;;  %1551 = vmatprep.subr.bf16.mxu0 %v1772_v0 }
 0x138   : > { %1539 = vmatprep.subr.bf16.mxu1 %v1772_v0  ;;  %v2013_v8 = vpop.f32.mrb[6].mxu0 }
 0x139   : > { %v2015_v9 = vpop.f32.mrb[7].mxu0 }
 0x13a   : > { %1553 = vmatpush3.bf16.msra.mxu0 %v1552_v2 }
 0x13b   : > { %1541 = vmatpush3.bf16.msra.mxu1 %v1540_v3  ;;  %1566 = vmatprep.subr.bf16.mxu0 %v1772_v0 }
 0x13c   : > { %1554 = vmatprep.subr.bf16.mxu1 %v1772_v0 }
 0x13d   : > { %1424 = vmatmul.mubr.msk.f32.vlgmr.msra.gmra.mrb[10].mxu0 %vm391_vm2, %v1343_v55 }
 0x13e   : > { %1405 = vmatmul.mubr.msk.f32.vlgmr.msra.gmra.mrb[2].mxu1 %vm391_vm2, %v354_v56  ;;  %1568 = vmatpush3.bf16.msra.mxu0 %v1567_v10 }
 0x13f   : > { %1556 = vmatpush3.bf16.msra.mxu1 %v1555_v11  ;;  %1569 = vmatprep.subr.bf16.mxu0 %v1772_v0 }
 0x140   : > { %1557 = vmatprep.subr.bf16.mxu1 %v1772_v0  ;;  %1461 = vmatprep.mubr.msk.f32.mxu0 %vm1773_vm1, %v1774_v36 }
 0x141   : > { %1442 = vmatprep.mubr.msk.f32.mxu1 %vm1773_vm1, %v1774_v36 }
 0x142   : > { %1571 = vmatpush3.bf16.msra.mxu0 %v1570_v16 }
 0x143   : > { %1559 = vmatpush3.bf16.msra.mxu1 %v1558_v17  ;;  %1572 = vmatprep.subr.bf16.mxu0 %v1772_v0 }
 0x144   : > { %1560 = vmatprep.subr.bf16.mxu1 %v1772_v0 }
 0x146   : > { %1574 = vmatpush3.bf16.msra.mxu0 %v1573_v22 }
 0x147   : > { %1562 = vmatpush3.bf16.msra.mxu1 %v1561_v23  ;;  %1575 = vmatprep.subr.bf16.mxu0 %v1772_v0 }
 0x148   : > { %1563 = vmatprep.subr.bf16.mxu1 %v1772_v0 }
 0x14a   : > { %1577 = vmatpush3.bf16.msra.mxu0 %v1576_v28 }
 0x14b   : > { %1565 = vmatpush3.bf16.msra.mxu1 %v1564_v29  ;;  %1590 = vmatprep.subr.bf16.mxu0 %v1772_v0 }
 0x14c   : > { %1578 = vmatprep.subr.bf16.mxu1 %v1772_v0 }
 0x14d   : > { %1462 = vmatmul.mubr.msk.f32.vlgmr.msra.gmra.mrb[12].mxu0 %vm391_vm2, %v2003_v63 }
 0x14e   : > { %1443 = vmatmul.mubr.msk.f32.vlgmr.msra.gmra.mrb[4].mxu1 %vm391_vm2, %v2005_v1  ;;  %1592 = vmatpush3.bf16.msra.mxu0 %v1591_v34 }
 0x14f   : > { %1580 = vmatpush3.bf16.msra.mxu1 %v1579_v35  ;;  %1593 = vmatprep.subr.bf16.mxu0 %v1772_v0 }
 0x150   : > { %1581 = vmatprep.subr.bf16.mxu1 %v1772_v0  ;;  %1499 = vmatprep.mubr.msk.f32.mxu0 %vm1773_vm1, %v1774_v36 }
 0x151   : > { %1480 = vmatprep.mubr.msk.f32.mxu1 %vm1773_vm1, %v1774_v36 }
 0x152   : > { %1595 = vmatpush3.bf16.msra.mxu0 %v1594_v41 }
 0x153   : > { %1583 = vmatpush3.bf16.msra.mxu1 %v1582_v42  ;;  %1596 = vmatprep.subr.bf16.mxu0 %v1772_v0 }
 0x154   : > { %1584 = vmatprep.subr.bf16.mxu1 %v1772_v0 }
 0x156   : > { %1598 = vmatpush3.bf16.msra.mxu0 %v1597_v47 }
 0x157   : > { %1586 = vmatpush3.bf16.msra.mxu1 %v1585_v48  ;;  %1599 = vmatprep.subr.bf16.mxu0 %v1772_v0 }
 0x158   : > { %1587 = vmatprep.subr.bf16.mxu1 %v1772_v0 }
 0x15a   : > { %1601 = vmatpush3.bf16.msra.mxu0 %v1600_v53 }
 0x15b   : > { %1589 = vmatpush3.bf16.msra.mxu1 %v1588_v54 }
 0x15d   : > { %1500 = vmatmul.mubr.msk.f32.vlgmr.msra.gmra.mrb[14].mxu0 %vm391_vm2, %v2013_v8 }
 0x15e   : > { %1481 = vmatmul.mubr.msk.f32.vlgmr.msra.gmra.mrb[6].mxu1 %vm391_vm2, %v2015_v9 }
 0x200   : > { %v544_v36 = vpop.f32.mrb[8].mxu0 }
 0x201   : > { %548 = vst [vmem:[%s230_s9 + $0x8] sm:$0xff] %v544_v36  ;;  %v461_v55 = vpop.f32.mrb[0].mxu1  ;;  %v1387_v56 = vpop.f32.mrb[9].mxu0 }
 0x202   : > { %465 = vst [vmem:[%s230_s9] sm:$0xff] %v461_v55  ;;  %v1368_v57 = vpop.f32.mrb[1].mxu1 }
 0x210   : > { %v710_v58 = vpop.f32.mrb[10].mxu0 }
 0x211   : > { %714 = vst [vmem:[%s230_s9 + $0x18] sm:$0xff] %v710_v58  ;;  %v627_v0 = vpop.f32.mrb[2].mxu1  ;;  %v1425_v59 = vpop.f32.mrb[11].mxu0 }
 0x212   : > { %631 = vst [vmem:[%s230_s9 + $0x10] sm:$0xff] %v627_v0  ;;  %v1406_v60 = vpop.f32.mrb[3].mxu1 }
 0x220   : > { %v876_v61 = vpop.f32.mrb[12].mxu0 }
 0x221   : > { %880 = vst [vmem:[%s230_s9 + $0x28] sm:$0xff] %v876_v61  ;;  %v793_v62 = vpop.f32.mrb[4].mxu1  ;;  %v1463_v63 = vpop.f32.mrb[13].mxu0 }
 0x222   : > { %797 = vst [vmem:[%s230_s9 + $0x20] sm:$0xff] %v793_v62  ;;  %v1444_v1 = vpop.f32.mrb[5].mxu1 }
 0x230   : > { %v1042_v2 = vpop.f32.mrb[14].mxu0 }
 0x231   : > { %1046 = vst [vmem:[%s230_s9 + $0x38] sm:$0xff] %v1042_v2  ;;  %v959_v3 = vpop.f32.mrb[6].mxu1  ;;  %v1501_v4 = vpop.f32.mrb[15].mxu0 }
 0x232   : > { %963 = vst [vmem:[%s230_s9 + $0x30] sm:$0xff] %v959_v3  ;;  %v1482_v5 = vpop.f32.mrb[7].mxu1 }
 0x233   : > { %1711 = shalt.err (!%p1708_p10)
}
 0x234   : > { %s1712_s24 = scalar_lea.hbm %s2086_s19, 1024  ;;  %s1716_s27 = scalar_lea.hbm %s2134_s4, 2048 }
 0x235   : > { %p1713_p12 = scmp.ne.s32.totalorder %s2086_s19, %s1712_s24  ;;  %p1717_p8 = scmp.lt.u32.totalorder %s2086_s19, %s2134_s4 }
 0x236   : > { %p1718_p2 = scmp.lt.u32.totalorder %s1716_s27, %s1712_s24  ;;  %p1720_p3 = scmp.lt.u32.totalorder %s1712_s24, %s2086_s19 }
 0x237   : > { %p1714_p0 = pnand %p1713_p12, %p2141_p4 }
 0x238   : > { %p1719_p11 = por %p1718_p2, %p1717_p8 }
 0x239   : > { %p1715_p6 = pneg %p1714_p0 }
 0x23a   : > { %p1721_p13 = por %p1720_p3, %p1719_p11 }
 0x23c   : > { %p1722_p1 = pnand %p1721_p13, %p1715_p6 }
 0x23e   : > { %1725 = shalt.err (!%p1722_p1)
}
 0x23f   : > { %s1776_s8 = smov 128   ;;  %s1777_s9 = smov 8  }
 0x240   : > { %1604 = dma.vmem_to_hbm [thread:$0]  (%p2141_p4), %s2081_s10, 1024, %s2086_s19, %s1048_s12, %s1776_s8, %s1776_s8, %s1777_s9  }
 0x241 PF: > { %s1076_s11 = sand.u32 1, %s1754_s20   ;;  %p2142_p5 = scmp.ne.s32.totalorder %s2139_s6, 0 }
 0x242   : > { %p2143_p7 = scmp.ge.s32.totalorder %s1766_s22, 2  ;;  %s1077_s17 = scalar_lea.sflag [#allocation6], %s1076_s11 }
 0x244   : > { %p1611_p9 = pnand %p2143_p7, %p2142_p5 }
 0x246   : > { %1749 = dma.done.wait (!%p1611_p9), %s1077_s17, 1024  }
 0x247   : > { %1751 = vsyncadd (!%p1611_p9), %s1077_s17, 4294966272  ;;  %p23_p10 = scmp.ge.s32.totalorder %s1831_s25, 4   ;;  %s2144_s20 = smov %s1758_s0 }
 0x248   : > { %s2145_s0 = smov %s1762_s21  ;;  %s2146_s21 = smov %s1843_s28 }
 0x249   : > { %s2147_s22 = smov %s1831_s25  ;;  %25 = sbr.rel (!%p23_p10) target bundleno = 20 (0x14), region = 90 }
 0x250   :  { %1082 = vsyncpa [#allocation5], 1 }
 0x251   :  { %1084 = vsyncpa [#allocation5 + $0x1], 1 }
 0x252   :  { %1085 = vsyncpa [#allocation6], 1 }
 0x253   :  { %1087 = vsyncpa [#allocation6 + $0x1], 1 }

</bundles_post_ra>
